<compile_context>
chip_gen: v7x
topology: tpu7x:2x2x1
jax: 0.10.0
libtpu: 0.0.40
codegen_flags: <defaults>
</compile_context>

<pallas_src>
import numpy as np
import jax
import jax.numpy as jnp
from jax.experimental import pallas as pl
from jax.experimental.pallas import tpu as pltpu


def _ricker(points, a):
    A = 2.0 / (np.sqrt(3.0 * float(a)) * np.pi ** 0.25)
    vec = np.arange(points, dtype=np.float32) - (points - 1.0) / 2.0
    xsq = vec ** 2
    wsq = float(a) ** 2
    mod = 1.0 - xsq / wsq
    gauss = np.exp(-xsq / (2.0 * wsq))
    return (A * mod * gauss).astype(np.float32)


def _morlet(points, s):
    x = (np.arange(points, dtype=np.float32) - (points - 1.0) / 2.0) / float(s)
    w = np.exp(-x ** 2 / 2.0) * np.cos(5.0 * x)
    return (np.sqrt(1.0 / float(s)) * w).astype(np.float32)


def _round_up(v, m):
    return ((v + m - 1) // m) * m


_GROUP = 8  # taps per pl.when-gated group (small static unroll, bounded live set)


def _make_cwt_kernel(n_groups, group, gw, tt, hw, b_pad):
    """One grid step = one (time tile, width). Shift-and-FMA over active taps."""

    def kernel(glo_ref, ghi_ref, g_ref, xc_ref, xn_ref, o_ref):
        s = pl.program_id(1)                       # width index (inner grid axis)
        lo = glo_ref[s]                            # first active tap group
        hi = ghi_ref[s]                            # one past last active group
        # Tile window with right halo: xpad lanes [t*TT, t*TT + TT + HW).
        # Static 128-multiple widths -> pure vreg placement, no realignment.
        xw = jnp.concatenate([xc_ref[...], xn_ref[:, :hw]], axis=-1)
        o_ref[0, :, :] = jnp.zeros((b_pad, tt), jnp.float32)
        g_base = s * gw                            # row offset into flat tap table

        for grp in range(n_groups):                # static groups, runtime-skipped
            @pl.when((grp >= lo) & (grp < hi))
            def _(grp=grp):
                j0 = grp * group
                part = g_ref[g_base + j0] * xw[:, j0:j0 + tt]
                for u in range(1, group):          # static unroll of 8 taps
                    j = j0 + u
                    part = part + g_ref[g_base + j] * xw[:, j:j + tt]
                o_ref[0, :, :] = o_ref[0, :, :] + part

    return kernel


def cwt_forward(x, widths=8, wavelet='ricker'):
    """x: (B, C, T) -> (B, C, S, T), matching CWT.forward semantics."""
    if isinstance(widths, int):
        widths = np.arange(1, widths - 1)          # mirrors the module exactly
    widths = [float(w) for w in list(widths)]
    wav_fn = _ricker if wavelet == 'ricker' else _morlet
    B, C, T = x.shape
    S = len(widths)

    # PyTorch conv1d(padding='same') cross-correlates the pre-flipped wavelet:
    #   out[t] = sum_k taps[k] * xsum[t + k - left],   left = (N-1)//2
    # Re-indexed onto one shared left-zero-padded signal xpad[u] = xsum[u - P]:
    #   out[s, t] = sum_j g[s, j] * xpad[t + j],  active j in [shift_s, shift_s+N_s)
    Ns = [int(min(10 * w, T)) for w in widths]
    lefts = [(n - 1) // 2 for n in Ns]
    P = max(lefts)
    shifts = [P - lefts[i] for i in range(S)]
    Jmax = max(shifts[i] + Ns[i] for i in range(S))

    G = _GROUP
    NG = _round_up(Jmax, G) // G                   # static tap groups per width
    GW = NG * G                                    # flat row length per width
    glo = np.array([shifts[i] // G for i in range(S)], np.int32)
    ghi = np.array([-(-(shifts[i] + Ns[i]) // G) for i in range(S)], np.int32)
    g_np = np.zeros((S, GW), np.float32)
    for i, w in enumerate(widths):
        taps = wav_fn(Ns[i], w)[::-1]              # conj is a no-op on real taps
        g_np[i, shifts[i]:shifts[i] + Ns[i]] = taps
    g_flat = g_np.reshape(-1)

    # Layout: batch on sublanes, time on lanes; time split into lane-dense tiles.
    B_pad = _round_up(max(B, 1), 8)
    HW = _round_up(Jmax, 128)                      # right halo, full lane columns
    pref = 512
    if B_pad > 8:                                  # keep the live vreg set bounded
        pref = max(128, ((512 * 8) // B_pad) // 128 * 128)
    TT = max(HW, min(pref, _round_up(T, 128)))     # time-tile width (lanes)
    TP = _round_up(T, TT)                          # padded output time length
    n_t = TP // TT
    L = (n_t + 1) * TT                             # +1 tile so the halo block exists

    # Hoisted channel reduction (one XLA reduce instead of S in-kernel ones).
    xsum = jnp.sum(x.astype(jnp.float32), axis=1)                        # (B, T)
    xpad = jnp.zeros((B_pad, L), jnp.float32).at[:B, P:P + T].set(xsum)  # (B_pad, L)

    flops = int(sum(2 * int(ghi[i] - glo[i]) * G * B_pad * TP for i in range(S)))
    bytes_accessed = int(4 * (2 * B_pad * TP + S * B_pad * TP + S * GW + 2 * S))
    vmem_limit = int(min(64 * 1024 * 1024,
                         max(8 * 1024 * 1024, 8 * B_pad * TT * 4 + (2 << 20))))

    out = pl.pallas_call(
        _make_cwt_kernel(NG, G, GW, TT, HW, B_pad),
        out_shape=jax.ShapeDtypeStruct((S, B_pad, TP), jnp.float32),
        grid=(n_t, S),                                             # t outer, s inner
        in_specs=[
            pl.BlockSpec(memory_space=pltpu.MemorySpace.SMEM),     # glo (S,)
            pl.BlockSpec(memory_space=pltpu.MemorySpace.SMEM),     # ghi (S,)
            pl.BlockSpec(memory_space=pltpu.MemorySpace.SMEM),     # flat tap table
            pl.BlockSpec((B_pad, TT), lambda t, s: (0, t)),        # current tile
            pl.BlockSpec((B_pad, TT), lambda t, s: (0, t + 1)),    # halo tile
        ],
        out_specs=pl.BlockSpec((1, B_pad, TT), lambda t, s: (s, 0, t)),
        compiler_params=pltpu.CompilerParams(
            dimension_semantics=("parallel", "parallel"),
            vmem_limit_bytes=vmem_limit),
        cost_estimate=pl.CostEstimate(flops=flops, transcendentals=0,
                                      bytes_accessed=bytes_accessed),
    )(jnp.asarray(glo), jnp.asarray(ghi), jnp.asarray(g_flat), xpad, xpad)

    out_bst = jnp.transpose(out[:, :B, :T], (1, 0, 2)).astype(x.dtype)   # (B, S, T)
    # All conv1d output channels are identical (weights broadcast over the
    # (out_ch, in_ch) dims with groups=1), so broadcasting over C is exact.
    return jnp.broadcast_to(out_bst[:, None, :, :], (B, C, S, T))


def _reference(x_np, widths, wavelet='ricker'):
    """Plain numpy reference of the same math (float64 accumulation)."""
    wav_fn = _ricker if wavelet == 'ricker' else _morlet
    B, C, T = x_np.shape
    xsum = x_np.astype(np.float64).sum(axis=1)                   # (B, T)
    outs = []
    for w in widths:
        N = int(min(10 * w, T))
        taps = wav_fn(N, w)[::-1].astype(np.float64)
        left = (N - 1) // 2
        o = np.zeros((B, T), np.float64)
        for k in range(N):
            lo = max(0, left - k)
            hi = min(T, T + left - k)
            if lo < hi:
                o[:, lo:hi] += taps[k] * xsum[:, lo + k - left: hi + k - left]
        outs.append(o)
    out = np.stack(outs, axis=1)                                 # (B, S, T)
    return np.broadcast_to(out[:, None], (B, C, len(widths), T)).astype(np.float32)


if __name__ == "__main__":
    key = jax.random.PRNGKey(0)

    # Small test matching the module defaults: widths=8 -> arange(1, 7), S = 6.
    B, C, T = 2, 4, 16
    x = jax.random.normal(key, (B, C, T), dtype=jnp.float32)
    out = cwt_forward(x, widths=8, wavelet='ricker')
    out = jax.block_until_ready(out)
    assert out.shape == (B, C, 6, T), out.shape
    ref = _reference(np.asarray(x), list(np.arange(1, 7)), 'ricker')
    np.testing.assert_allclose(np.asarray(out), ref, rtol=1e-4, atol=1e-4)

    # Second check exercising multiple time tiles + the halo block (n_t > 1).
    B2, C2, T2 = 3, 2, 1200
    w2 = np.arange(1, 8)
    x2 = jax.random.normal(jax.random.PRNGKey(1), (B2, C2, T2), dtype=jnp.float32)
    out2 = jax.block_until_ready(cwt_forward(x2, widths=w2, wavelet='ricker'))
    assert out2.shape == (B2, C2, len(w2), T2), out2.shape
    ref2 = _reference(np.asarray(x2), list(w2), 'ricker')
    np.testing.assert_allclose(np.asarray(out2), ref2, rtol=1e-4, atol=1e-4)

    print("KERNEL_OK")
</pallas_src>

<mosaic_0001>
module attributes {stable_mosaic.version = 11 : i64} {
  func.func @kernel(%arg0: i32, %arg1: i32, %arg2: memref<6xi32, #tpu.memory_space<smem>>, %arg3: memref<6xi32, #tpu.memory_space<smem>>, %arg4: memref<96xf32, #tpu.memory_space<smem>>, %arg5: memref<8x128xf32, #tpu.memory_space<vmem>>, %arg6: memref<8x128xf32, #tpu.memory_space<vmem>>, %arg7: memref<1x8x128xf32, #tpu.memory_space<vmem>>) attributes {dimension_semantics = [#tpu.dimension_semantics<parallel>, #tpu.dimension_semantics<parallel>], iteration_bounds = array<i64: 1, 6>, scalar_prefetch = 0 : i64, scratch_operands = 0 : i64, tpu.core_type = #tpu.core_type<tc>, window_params = [{transform_indices = @transform_0, window_bounds = array<i64: 6>}, {transform_indices = @transform_1, window_bounds = array<i64: 6>}, {transform_indices = @transform_2, window_bounds = array<i64: 96>}, {transform_indices = @transform_3, window_bounds = array<i64: 8, 128>}, {transform_indices = @transform_4, window_bounds = array<i64: 8, 128>}, {transform_indices = @transform_5, window_bounds = array<i64: 1, 8, 128>}]} {
    %0 = arith.index_cast %arg1 : i32 to index
    %1 = memref.load %arg2[%0] : memref<6xi32, #tpu.memory_space<smem>>
    %2 = arith.index_cast %arg1 : i32 to index
    %3 = memref.load %arg3[%2] : memref<6xi32, #tpu.memory_space<smem>>
    %c0 = arith.constant 0 : index
    %c0_0 = arith.constant 0 : index
    %4 = vector.load %arg5[%c0, %c0_0] : memref<8x128xf32, #tpu.memory_space<vmem>>, vector<8x128xf32>
    %c0_1 = arith.constant 0 : index
    %c0_2 = arith.constant 0 : index
    %5 = vector.load %arg6[%c0_1, %c0_2] : memref<8x128xf32, #tpu.memory_space<vmem>>, vector<8x128xf32>
    %6 = tpu.concatenate %4, %5 in 1 : vector<8x128xf32>, vector<8x128xf32> -> vector<8x256xf32>
    %cst = arith.constant 0.000000e+00 : f32
    %7 = vector.broadcast %cst : f32 to vector<8x128xf32>
    %c0_3 = arith.constant 0 : index
    %c0_4 = arith.constant 0 : index
    %c0_5 = arith.constant 0 : index
    %8 = vector.load %arg7[%c0_3, %c0_4, %c0_5] : memref<1x8x128xf32, #tpu.memory_space<vmem>>, vector<1x8x128xf32>
    %9 = vector.shape_cast %8 : vector<1x8x128xf32> to vector<8x128xf32>
    %10 = vector.shape_cast %7 : vector<8x128xf32> to vector<1x8x128xf32>
    tpu.vector_store %arg7[%c0_3, %c0_4, %c0_5], %10 {strides = array<i32>} : memref<1x8x128xf32, #tpu.memory_space<vmem>>, vector<1x8x128xf32>,
    %c16_i32 = arith.constant 16 : i32
    %11 = arith.muli %arg1, %c16_i32 : i32
    %c0_i32 = arith.constant 0 : i32
    %12 = arith.cmpi sle, %1, %c0_i32 : i32
    %c0_i32_6 = arith.constant 0 : i32
    %13 = arith.cmpi sgt, %3, %c0_i32_6 : i32
    %14 = arith.andi %12, %13 : i1
    %15 = arith.extui %14 : i1 to i32
    %c0_i32_7 = arith.constant 0 : i32
    %16 = arith.cmpi ne, %15, %c0_i32_7 : i32
    scf.if %16 {
      %c0_i32_10 = arith.constant 0 : i32
      %22 = arith.addi %11, %c0_i32_10 : i32
      %23 = arith.index_cast %22 : i32 to index
      %24 = memref.load %arg4[%23] : memref<96xf32, #tpu.memory_space<smem>>
      %25 = vector.extract_strided_slice %6 {offsets = [0, 0], sizes = [8, 128], strides = [1, 1]} : vector<8x256xf32> to vector<8x128xf32>
      %26 = vector.broadcast %24 : f32 to vector<8x128xf32>
      %27 = arith.mulf %26, %25 : vector<8x128xf32>
      %c1_i32_11 = arith.constant 1 : i32
      %28 = arith.addi %11, %c1_i32_11 : i32
      %29 = arith.index_cast %28 : i32 to index
      %30 = memref.load %arg4[%29] : memref<96xf32, #tpu.memory_space<smem>>
      %31 = vector.extract_strided_slice %6 {offsets = [0, 1], sizes = [8, 128], strides = [1, 1]} : vector<8x256xf32> to vector<8x128xf32>
      %32 = vector.broadcast %30 : f32 to vector<8x128xf32>
      %33 = arith.mulf %32, %31 : vector<8x128xf32>
      %34 = arith.addf %27, %33 : vector<8x128xf32>
      %c2_i32 = arith.constant 2 : i32
      %35 = arith.addi %11, %c2_i32 : i32
      %36 = arith.index_cast %35 : i32 to index
      %37 = memref.load %arg4[%36] : memref<96xf32, #tpu.memory_space<smem>>
      %38 = vector.extract_strided_slice %6 {offsets = [0, 2], sizes = [8, 128], strides = [1, 1]} : vector<8x256xf32> to vector<8x128xf32>
      %39 = vector.broadcast %37 : f32 to vector<8x128xf32>
      %40 = arith.mulf %39, %38 : vector<8x128xf32>
      %41 = arith.addf %34, %40 : vector<8x128xf32>
      %c3_i32 = arith.constant 3 : i32
      %42 = arith.addi %11, %c3_i32 : i32
      %43 = arith.index_cast %42 : i32 to index
      %44 = memref.load %arg4[%43] : memref<96xf32, #tpu.memory_space<smem>>
      %45 = vector.extract_strided_slice %6 {offsets = [0, 3], sizes = [8, 128], strides = [1, 1]} : vector<8x256xf32> to vector<8x128xf32>
      %46 = vector.broadcast %44 : f32 to vector<8x128xf32>
      %47 = arith.mulf %46, %45 : vector<8x128xf32>
      %48 = arith.addf %41, %47 : vector<8x128xf32>
      %c4_i32 = arith.constant 4 : i32
      %49 = arith.addi %11, %c4_i32 : i32
      %50 = arith.index_cast %49 : i32 to index
      %51 = memref.load %arg4[%50] : memref<96xf32, #tpu.memory_space<smem>>
      %52 = vector.extract_strided_slice %6 {offsets = [0, 4], sizes = [8, 128], strides = [1, 1]} : vector<8x256xf32> to vector<8x128xf32>
      %53 = vector.broadcast %51 : f32 to vector<8x128xf32>
      %54 = arith.mulf %53, %52 : vector<8x128xf32>
      %55 = arith.addf %48, %54 : vector<8x128xf32>
      %c5_i32 = arith.constant 5 : i32
      %56 = arith.addi %11, %c5_i32 : i32
      %57 = arith.index_cast %56 : i32 to index
      %58 = memref.load %arg4[%57] : memref<96xf32, #tpu.memory_space<smem>>
      %59 = vector.extract_strided_slice %6 {offsets = [0, 5], sizes = [8, 128], strides = [1, 1]} : vector<8x256xf32> to vector<8x128xf32>
      %60 = vector.broadcast %58 : f32 to vector<8x128xf32>
      %61 = arith.mulf %60, %59 : vector<8x128xf32>
      %62 = arith.addf %55, %61 : vector<8x128xf32>
      %c6_i32 = arith.constant 6 : i32
      %63 = arith.addi %11, %c6_i32 : i32
      %64 = arith.index_cast %63 : i32 to index
      %65 = memref.load %arg4[%64] : memref<96xf32, #tpu.memory_space<smem>>
      %66 = vector.extract_strided_slice %6 {offsets = [0, 6], sizes = [8, 128], strides = [1, 1]} : vector<8x256xf32> to vector<8x128xf32>
      %67 = vector.broadcast %65 : f32 to vector<8x128xf32>
      %68 = arith.mulf %67, %66 : vector<8x128xf32>
      %69 = arith.addf %62, %68 : vector<8x128xf32>
      %c7_i32 = arith.constant 7 : i32
      %70 = arith.addi %11, %c7_i32 : i32
      %71 = arith.index_cast %70 : i32 to index
      %72 = memref.load %arg4[%71] : memref<96xf32, #tpu.memory_space<smem>>
      %73 = vector.extract_strided_slice %6 {offsets = [0, 7], sizes = [8, 128], strides = [1, 1]} : vector<8x256xf32> to vector<8x128xf32>
      %74 = vector.broadcast %72 : f32 to vector<8x128xf32>
      %75 = arith.mulf %74, %73 : vector<8x128xf32>
      %76 = arith.addf %69, %75 : vector<8x128xf32>
      %c0_12 = arith.constant 0 : index
      %c0_13 = arith.constant 0 : index
      %c0_14 = arith.constant 0 : index
      %77 = vector.load %arg7[%c0_12, %c0_13, %c0_14] : memref<1x8x128xf32, #tpu.memory_space<vmem>>, vector<1x8x128xf32>
      %78 = vector.shape_cast %77 : vector<1x8x128xf32> to vector<8x128xf32>
      %79 = arith.addf %78, %76 : vector<8x128xf32>
      %c0_15 = arith.constant 0 : index
      %c0_16 = arith.constant 0 : index
      %c0_17 = arith.constant 0 : index
      %80 = vector.load %arg7[%c0_15, %c0_16, %c0_17] : memref<1x8x128xf32, #tpu.memory_space<vmem>>, vector<1x8x128xf32>
      %81 = vector.shape_cast %80 : vector<1x8x128xf32> to vector<8x128xf32>
      %82 = vector.shape_cast %79 : vector<8x128xf32> to vector<1x8x128xf32>
      tpu.vector_store %arg7[%c0_15, %c0_16, %c0_17], %82 {strides = array<i32>} : memref<1x8x128xf32, #tpu.memory_space<vmem>>, vector<1x8x128xf32>,
    } else {
    }
    %c1_i32 = arith.constant 1 : i32
    %17 = arith.cmpi sle, %1, %c1_i32 : i32
    %c1_i32_8 = arith.constant 1 : i32
    %18 = arith.cmpi sgt, %3, %c1_i32_8 : i32
    %19 = arith.andi %17, %18 : i1
    %20 = arith.extui %19 : i1 to i32
    %c0_i32_9 = arith.constant 0 : i32
    %21 = arith.cmpi ne, %20, %c0_i32_9 : i32
    scf.if %21 {
      %c8_i32 = arith.constant 8 : i32
      %22 = arith.addi %11, %c8_i32 : i32
      %23 = arith.index_cast %22 : i32 to index
      %24 = memref.load %arg4[%23] : memref<96xf32, #tpu.memory_space<smem>>
      %25 = vector.extract_strided_slice %6 {offsets = [0, 8], sizes = [8, 128], strides = [1, 1]} : vector<8x256xf32> to vector<8x128xf32>
      %26 = vector.broadcast %24 : f32 to vector<8x128xf32>
      %27 = arith.mulf %26, %25 : vector<8x128xf32>
      %c9_i32 = arith.constant 9 : i32
      %28 = arith.addi %11, %c9_i32 : i32
      %29 = arith.index_cast %28 : i32 to index
      %30 = memref.load %arg4[%29] : memref<96xf32, #tpu.memory_space<smem>>
      %31 = vector.extract_strided_slice %6 {offsets = [0, 9], sizes = [8, 128], strides = [1, 1]} : vector<8x256xf32> to vector<8x128xf32>
      %32 = vector.broadcast %30 : f32 to vector<8x128xf32>
      %33 = arith.mulf %32, %31 : vector<8x128xf32>
      %34 = arith.addf %27, %33 : vector<8x128xf32>
      %c10_i32 = arith.constant 10 : i32
      %35 = arith.addi %11, %c10_i32 : i32
      %36 = arith.index_cast %35 : i32 to index
      %37 = memref.load %arg4[%36] : memref<96xf32, #tpu.memory_space<smem>>
      %38 = vector.extract_strided_slice %6 {offsets = [0, 10], sizes = [8, 128], strides = [1, 1]} : vector<8x256xf32> to vector<8x128xf32>
      %39 = vector.broadcast %37 : f32 to vector<8x128xf32>
      %40 = arith.mulf %39, %38 : vector<8x128xf32>
      %41 = arith.addf %34, %40 : vector<8x128xf32>
      %c11_i32 = arith.constant 11 : i32
      %42 = arith.addi %11, %c11_i32 : i32
      %43 = arith.index_cast %42 : i32 to index
      %44 = memref.load %arg4[%43] : memref<96xf32, #tpu.memory_space<smem>>
      %45 = vector.extract_strided_slice %6 {offsets = [0, 11], sizes = [8, 128], strides = [1, 1]} : vector<8x256xf32> to vector<8x128xf32>
      %46 = vector.broadcast %44 : f32 to vector<8x128xf32>
      %47 = arith.mulf %46, %45 : vector<8x128xf32>
      %48 = arith.addf %41, %47 : vector<8x128xf32>
      %c12_i32 = arith.constant 12 : i32
      %49 = arith.addi %11, %c12_i32 : i32
      %50 = arith.index_cast %49 : i32 to index
      %51 = memref.load %arg4[%50] : memref<96xf32, #tpu.memory_space<smem>>
      %52 = vector.extract_strided_slice %6 {offsets = [0, 12], sizes = [8, 128], strides = [1, 1]} : vector<8x256xf32> to vector<8x128xf32>
      %53 = vector.broadcast %51 : f32 to vector<8x128xf32>
      %54 = arith.mulf %53, %52 : vector<8x128xf32>
      %55 = arith.addf %48, %54 : vector<8x128xf32>
      %c13_i32 = arith.constant 13 : i32
      %56 = arith.addi %11, %c13_i32 : i32
      %57 = arith.index_cast %56 : i32 to index
      %58 = memref.load %arg4[%57] : memref<96xf32, #tpu.memory_space<smem>>
      %59 = vector.extract_strided_slice %6 {offsets = [0, 13], sizes = [8, 128], strides = [1, 1]} : vector<8x256xf32> to vector<8x128xf32>
      %60 = vector.broadcast %58 : f32 to vector<8x128xf32>
      %61 = arith.mulf %60, %59 : vector<8x128xf32>
      %62 = arith.addf %55, %61 : vector<8x128xf32>
      %c14_i32 = arith.constant 14 : i32
      %63 = arith.addi %11, %c14_i32 : i32
      %64 = arith.index_cast %63 : i32 to index
      %65 = memref.load %arg4[%64] : memref<96xf32, #tpu.memory_space<smem>>
      %66 = vector.extract_strided_slice %6 {offsets = [0, 14], sizes = [8, 128], strides = [1, 1]} : vector<8x256xf32> to vector<8x128xf32>
      %67 = vector.broadcast %65 : f32 to vector<8x128xf32>
      %68 = arith.mulf %67, %66 : vector<8x128xf32>
      %69 = arith.addf %62, %68 : vector<8x128xf32>
      %c15_i32 = arith.constant 15 : i32
      %70 = arith.addi %11, %c15_i32 : i32
      %71 = arith.index_cast %70 : i32 to index
      %72 = memref.load %arg4[%71] : memref<96xf32, #tpu.memory_space<smem>>
      %73 = vector.extract_strided_slice %6 {offsets = [0, 15], sizes = [8, 128], strides = [1, 1]} : vector<8x256xf32> to vector<8x128xf32>
      %74 = vector.broadcast %72 : f32 to vector<8x128xf32>
      %75 = arith.mulf %74, %73 : vector<8x128xf32>
      %76 = arith.addf %69, %75 : vector<8x128xf32>
      %c0_10 = arith.constant 0 : index
      %c0_11 = arith.constant 0 : index
      %c0_12 = arith.constant 0 : index
      %77 = vector.load %arg7[%c0_10, %c0_11, %c0_12] : memref<1x8x128xf32, #tpu.memory_space<vmem>>, vector<1x8x128xf32>
      %78 = vector.shape_cast %77 : vector<1x8x128xf32> to vector<8x128xf32>
      %79 = arith.addf %78, %76 : vector<8x128xf32>
      %c0_13 = arith.constant 0 : index
      %c0_14 = arith.constant 0 : index
      %c0_15 = arith.constant 0 : index
      %80 = vector.load %arg7[%c0_13, %c0_14, %c0_15] : memref<1x8x128xf32, #tpu.memory_space<vmem>>, vector<1x8x128xf32>
      %81 = vector.shape_cast %80 : vector<1x8x128xf32> to vector<8x128xf32>
      %82 = vector.shape_cast %79 : vector<8x128xf32> to vector<1x8x128xf32>
      tpu.vector_store %arg7[%c0_13, %c0_14, %c0_15], %82 {strides = array<i32>} : memref<1x8x128xf32, #tpu.memory_space<vmem>>, vector<1x8x128xf32>,
    } else {
    }
    return
  }
  func.func @transform_0(%arg0: i32, %arg1: i32) -> i32 {
    %c0_i32 = arith.constant 0 : i32
    %c0_i32_0 = arith.constant 0 : i32
    return %c0_i32 : i32
  }
  func.func @transform_1(%arg0: i32, %arg1: i32) -> i32 {
    %c0_i32 = arith.constant 0 : i32
    %c0_i32_0 = arith.constant 0 : i32
    return %c0_i32 : i32
  }
  func.func @transform_2(%arg0: i32, %arg1: i32) -> i32 {
    %c0_i32 = arith.constant 0 : i32
    %c0_i32_0 = arith.constant 0 : i32
    return %c0_i32 : i32
  }
  func.func @transform_3(%arg0: i32, %arg1: i32) -> (i32, i32) {
    %c0_i32 = arith.constant 0 : i32
    %c0_i32_0 = arith.constant 0 : i32
    return %c0_i32, %arg0 : i32, i32
  }
  func.func @transform_4(%arg0: i32, %arg1: i32) -> (i32, i32) {
    %c1_i32 = arith.constant 1 : i32
    %0 = arith.addi %arg0, %c1_i32 : i32
    %c0_i32 = arith.constant 0 : i32
    %c0_i32_0 = arith.constant 0 : i32
    return %c0_i32, %0 : i32, i32
  }
  func.func @transform_5(%arg0: i32, %arg1: i32) -> (i32, i32, i32) {
    %c0_i32 = arith.constant 0 : i32
    %c0_i32_0 = arith.constant 0 : i32
    return %arg1, %c0_i32, %arg0 : i32, i32, i32
  }
}

</mosaic_0001>

<bundles_post_ra>
// kernel: tpu_custom_call.1
= control target key start
LH: loop header
LB: loop body
LE: loop exit
PB: predicated region body
PF: predicated region fallthrough
CT: control target
= control target key end

     0   :  { %s1389_s0 = inlined_call_operand.hbm [shape: s32[6], index: 0, kind: input, shape index: {}]   ;;  %s1390_s1 = inlined_call_operand.vmem [shape: s32[6], index: 1, kind: input, shape index: {}]   ;;  %s1391_s2 = inlined_call_operand.vmem [shape: f32[96], index: 2, kind: input, shape index: {}]   ;;  %s1392_s3 = inlined_call_operand.hbm [shape: f32[8,256], index: 3, kind: input, shape index: {}]   ;;  %s1393_s4 = inlined_call_operand.hbm [shape: f32[8,256], index: 4, kind: input, shape index: {}]   ;;  %s1394_s5 = inlined_call_operand.hbm [shape: f32[6,8,128], index: 5, kind: output, shape index: {}]  }
   0x1   :  { %1400 = sst [smem:[#allocation20_spill]] %s1389_s0 }
   0x2   :  { %1401 = sst [smem:[#allocation21_spill]] %s1390_s1 }
   0x3   :  { %10 = vsyncpa [#allocation5], 0 }
   0x4   :  { %11 = vsyncpa [#allocation6], 0 }
   0x5   :  { %12 = vsyncpa [#allocation9], 0 }
   0x6   :  { %13 = vsyncpa [#allocation3], 0 }
   0x7   :  { %14 = vsyncpa [#allocation12], 0 }
   0x8   :  { %15 = vsyncpa [#allocation4], 0 }
   0x9   :  { %17 = vsyncpa [#allocation4 + $0x1], 0  ;;  %s1092_s18 = smov 0   ;;  %s1094_s19 = smov 0  }
   0xa   :  { %s1096_s20 = smov 0   ;;  %s1098_s21 = smov 0  }
   0xb   :  { %s1100_s22 = smov 0   ;;  %s1102_s23 = smov 0  }
   0xc LB: > { %s696_s24 = sadd.s32 4294967295, %s1038_s23   ;;  %s697_s25 = sadd.s32 4294967294, %s1038_s23   ;;  %s1038_s23 = sphi %s1102_s23, %s23_s23   ;;  %s1034_s22 = sphi %s1100_s22, %s1419_s22   ;;  %s1030_s21 = sphi %s1098_s21, %s1418_s21   ;;  %s1026_s20 = sphi %s1096_s20, %s1417_s20   ;;  %s1022_s19 = sphi %s1094_s19, %s1416_s19   ;;  %s1018_s18 = sphi %s1092_s18, %s1415_s18  }
   0xd   : > { %s32_s26 = sadd.s32 1, %s1034_s22  ;;  %s161_s27 = sadd.s32 1, %s1026_s20 }
   0xe   : > { %p33_p0 = scmp.ge.s32.totalorder %s32_s26, 6  ;;  %p171_p1 = scmp.ne.s32.totalorder %s1026_s20, %s1022_s19 }
   0xf   : > { %p172_p2 = scmp.eq.s32.totalorder %s696_s24, 5  ;;  %p177_p3 = scmp.ne.s32.totalorder %s1022_s19, %s1018_s18 }
  0x10   : > { %s1421_s26 = smov (%p33_p0, %s32_s26), 0  ;;  %p178_p5 = scmp.eq.s32.totalorder %s697_s25, 5 }
  0x11   : > { %p1132_p4 = por %p172_p2, %p171_p1  ;;  %s156_s29 = ssub.s32 %s1034_s22, %s1421_s26 }
  0x12   : > { %p698_p6 = scmp.ge.s32.totalorder %s1038_s23, 1  ;;  %p159_p7 = scmp.eq.s32.totalorder %s156_s29, 0 }
  0x13   : > { %s1402_s28 = scalar_select %p1132_p4, 1, 0 }
  0x14   : > { %p1139_p8 = por %p178_p5, %p177_p3  ;;  %p185_p9 = scmp.lt.s32.totalorder %s1038_s23, 7 }
  0x15   : > { %s1145_s6 = scalar_select %p159_p7, %s1026_s20, %s161_s27  }
  0x16   : > { %s1403_s30 = scalar_select %p1139_p8, 1, 0 }
  0x17   : > { %p1147_p10 = pnand %p698_p6, %p185_p9  ;;  %p1151_p11 = scmp.eq.s32.totalorder %s696_s24, 0 }
  0x18   : > { %s1406_s1 = sld [smem:[#allocation21_spill]]  ;;  %s218_s14 = sshll.u32 %s1391_s2, 4  ;;  %s1169_s14 = int_to_ptr.vmem [resolvable:$true] %s218_s14 }
  0x19   : > { %s1404_s7 = scalar_select %p1147_p10, 1, 0 }
  0x1a   : > { %s1405_s8 = scalar_select %p1151_p11, 1, 0 }
  0x1b   : > { %p738_p12 = pneg %p1147_p10  ;;  %s1040_s16 = smov [#allocation10]  }
  0x1c   : > { %s1171_s17 = sshll.u32 %s1040_s16, 4  ;;  %s1408_s0 = sld [smem:[#allocation20_spill]]  ;;  %s232_s17 = int_to_ptr.vmem [resolvable:$true] %s1171_s17 }
  0x1d   : > { %p1165_p13 = pnand %p1151_p11, %p738_p12 }
  0x1e   : > { %s207_s11 = sshll.u32 %s1406_s1, 4  ;;  %s208_s11 = int_to_ptr.vmem [resolvable:$true] %s207_s11 }
  0x1f   : > { %s1407_s15 = scalar_select %p1165_p13, 1, 0 }
  0x20   : > { %p1181_p1 = pneg %p1165_p13 }
  0x22   : > { %s838_s27 = scalar_lea.hbm %s1408_s0, 16 }
  0x23   : > { %p839_p0 = scmp.ne.s32.totalorder %s1408_s0, %s838_s27  ;;  %p845_p5 = scmp.lt.u32.totalorder %s838_s27, %s1408_s0 }
  0x25   : > { %p841_p2 = pnand %p1181_p1, %p839_p0 }
  0x27   : > { %p842_p3 = pneg %p841_p2 }
  0x29   : > { %p847_p6 = pnand %p845_p5, %p842_p3 }
  0x2b   : > { %850 = shalt.err (!%p847_p6)
}
  0x2c   : > { %s1041_s16 = smov [#allocation2]   ;;  %s851_s29 = scalar_lea.vmem %s208_s11, 16 }
  0x2d   : > { %741 = dma.hbm_to_smem (!%p1165_p13), %s1408_s0, 16, %s1041_s16, [#allocation5]  }
  0x2e   : > { %p852_p7 = scmp.ne.s32.totalorder %s208_s11, %s851_s29  ;;  %p859_p0 = scmp.lt.s32.totalorder %s208_s11, %s208_s11 }
  0x2f   : > { %p860_p2 = scmp.lt.s32.totalorder %s851_s29, %s851_s29 }
  0x30   : > { %p854_p9 = pnand %p852_p7, %p1181_p1 }
  0x31   : > { %p861_p8 = por %p860_p2, %p859_p0 }
  0x32   : > { %p855_p12 = pneg %p854_p9 }
  0x34   : > { %p862_p4 = pnand %p861_p8, %p855_p12 }
  0x36   : > { %865 = shalt.err (!%p862_p4)
}
  0x37   : > { %s1042_s27 = smov [#allocation7]   ;;  %s866_s9 = scalar_lea.vmem %s1169_s14, 16 }
  0x38   : > { %744 = dma.vmem_to_smem (!%p1165_p13), %s208_s11, 16, %s1042_s27, [#allocation6]  }
  0x39   : > { %p867_p3 = scmp.ne.s32.totalorder %s1169_s14, %s866_s9  ;;  %p874_p7 = scmp.lt.s32.totalorder %s1169_s14, %s1169_s14 }
  0x3a   : > { %p875_p9 = scmp.lt.s32.totalorder %s866_s9, %s866_s9 }
  0x3b   : > { %p869_p5 = pnand %p867_p3, %p1181_p1 }
  0x3c   : > { %p876_p11 = por %p875_p9, %p874_p7 }
  0x3d   : > { %p870_p6 = pneg %p869_p5 }
  0x3f   : > { %p877_p0 = pnand %p876_p11, %p870_p6 }
  0x41   : > { %880 = shalt.err (!%p877_p0)
}
  0x42   : > { %s1043_s12 = smov [#allocation8]   ;;  %s881_s16 = scalar_lea.hbm %s1392_s3, 128 }
  0x43   : > { %747 = dma.vmem_to_smem (!%p1165_p13), %s1169_s14, 16, %s1043_s12, [#allocation9]  }
  0x44   : > { %p882_p4 = scmp.ne.s32.totalorder %s1392_s3, %s881_s16  ;;  %s886_s9 = scalar_lea.hbm %s1392_s3, 256 }
  0x45   : > { %p887_p12 = scmp.lt.u32.totalorder %s886_s9, %s881_s16  ;;  %p888_p2 = scmp.lt.u32.totalorder %s881_s16, %s1392_s3 }
  0x46   : > { %p884_p8 = pnand %p882_p4, %p1181_p1 }
  0x47   : > { %p889_p3 = por %p888_p2, %p887_p12 }
  0x48   : > { %p885_p11 = pneg %p884_p8 }
  0x4a   : > { %p890_p5 = pnand %p889_p3, %p885_p11 }
  0x4c   : > { %893 = shalt.err (!%p890_p5)
}
  0x4d   : > { %s894_s14 = scalar_lea.vmem %s232_s17, 128  ;;  %p902_p0 = scmp.lt.s32.totalorder %s232_s17, %s232_s17 }
  0x4e   : > { %p895_p6 = scmp.ne.s32.totalorder %s232_s17, %s894_s14  ;;  %p903_p4 = scmp.lt.s32.totalorder %s894_s14, %s894_s14 }
  0x50   : > { %p897_p7 = pnand %p895_p6, %p1181_p1  ;;  %p904_p8 = por %p903_p4, %p902_p0 }
  0x52   : > { %p898_p9 = pneg %p897_p7 }
  0x54   : > { %p905_p10 = pnand %p904_p8, %p898_p9 }
  0x56   : > { %908 = shalt.err (!%p905_p10)
}
  0x57   : > { %750 = dma.hbm_to_vmem [thread:$0]  (!%p1165_p13), %s1392_s3, 128, %s232_s17, [#allocation3]  }
  0x58   : > { %s615_s13 = scalar_lea.hbm %s1393_s4, 128  ;;  %s1044_s16 = smov [#allocation11]  }
  0x59   : > { %s245_s24 = sshll.u32 %s1044_s16, 4  ;;  %s939_s27 = scalar_lea.hbm %s1393_s4, 256  ;;  %s246_s24 = int_to_ptr.vmem [resolvable:$true] %s245_s24 }
  0x5a   : > { %p910_p11 = scmp.ne.s32.totalorder %s615_s13, %s939_s27  ;;  %p915_p2 = scmp.lt.u32.totalorder %s615_s13, %s1393_s4 }
  0x5b   : > { %p916_p3 = scmp.lt.u32.totalorder %s939_s27, %s939_s27  ;;  %p918_p6 = scmp.lt.u32.totalorder %s939_s27, %s615_s13 }
  0x5c   : > { %p912_p10 = pnand %p910_p11, %p1181_p1 }
  0x5d   : > { %p917_p5 = por %p916_p3, %p915_p2 }
  0x5e   : > { %p913_p12 = pneg %p912_p10 }
  0x5f   : > { %p919_p7 = por %p918_p6, %p917_p5 }
  0x61   : > { %p920_p9 = pnand %p919_p7, %p913_p12 }
  0x63   : > { %923 = shalt.err (!%p920_p9)
}
  0x64   : > { %s924_s17 = scalar_lea.vmem %s246_s24, 128  ;;  %p932_p13 = scmp.lt.s32.totalorder %s246_s24, %s246_s24 }
  0x65   : > { %p925_p0 = scmp.ne.s32.totalorder %s246_s24, %s924_s17  ;;  %p933_p11 = scmp.lt.s32.totalorder %s924_s17, %s924_s17 }
  0x67   : > { %p927_p4 = pnand %p925_p0, %p1181_p1  ;;  %p934_p10 = por %p933_p11, %p932_p13 }
  0x69   : > { %p928_p8 = pneg %p927_p4 }
  0x6b   : > { %p935_p2 = pnand %p934_p10, %p928_p8 }
  0x6d   : > { %938 = shalt.err (!%p935_p2)
}
  0x6e   : > { %p1410_p3 = scmp.ne.s32.totalorder %s1407_s15, 0  ;;  %p1411_p5 = scmp.ne.s32.totalorder %s1404_s7, 0 }
  0x6f   : > { %p1412_p12 = scmp.ne.s32.totalorder (!%p1411_p5), %s1405_s8, 0 }
  0x70   : > { %753 = dma.hbm_to_vmem [thread:$0]  (!%p1410_p3), %s615_s13, 128, %s246_s24, [#allocation12]  }
  0x71   : > { %258 = sbr.rel (%p1411_p5) target bundleno = 597 (0x255), region = 40 }
  0x78   : > { %993 = dma.done.wait (%p1412_p12), [#allocation5], 16  }
  0x79   : > { %995 = vsyncadd (%p1412_p12), [#allocation5], 4294967280 }
  0x7a   : > { %997 = dma.done.wait (%p1412_p12), [#allocation6], 16  }
  0x7b   : > { %999 = vsyncadd (%p1412_p12), [#allocation6], 4294967280 }
  0x7c   : > { %1001 = dma.done.wait (%p1412_p12), [#allocation9], 16  }
  0x7d   : > { %1003 = vsyncadd (%p1412_p12), [#allocation9], 4294967280 }
  0x7e   : > { %1005 = dma.done.wait (%p1412_p12), [#allocation3], 128  }
  0x7f   : > { %1007 = vsyncadd (%p1412_p12), [#allocation3], 4294967168 }
  0x80   : > { %1009 = dma.done.wait (%p1412_p12), [#allocation12], 128  }
  0x81   : > { %1011 = vsyncadd (%p1412_p12), [#allocation12], 4294967168 }
  0x82   : > { %280 = sfence }
  0x83   : > { %s295_s7 = sand.u32 1, %s1022_s19   ;;  %s1269_s15 = sld [smem:[#allocation2 + %s1030_s21]]  ;;  %v1271_v0 = vld [vmem:[#allocation10] sm:$0xff]  ;;  %v1273_v1 = vld [vmem:[#allocation11] sm:$0xff]  ;;  %v1045_v2 = vmov 0.0  }
  0x84   : > { %s710_s10 = sshll.u32 %s295_s7, 3  ;;  %s1278_s12 = sld [smem:[#allocation7 + %s1030_s21]] }
  0x85   : > { %s1281_s8 = sshll.u32 %s1030_s21, 4  ;;  %s1283_s11 = scalar_lea.vmem [#allocation13], %s710_s10 }
  0x86   : > { %303 = vst [vmem:[%s1283_s11] sm:$0xff] %v1045_v2 }
  0x89   : > { %p305_p13 = scmp.le.s32.totalorder %s1269_s15, 0 }
  0x8a   : > { %p306_p1 = scmp.gt.s32.totalorder %s1278_s12, 0 }
  0x8c   : > { %p307_p6 = pnand %p306_p1, %p305_p13 }
  0x8d   : > { %s329_s0 = sadd.s32 (!%p307_p6), 2, %s1281_s8  ;;  %s314_s13 = sadd.s32 (!%p307_p6), 1, %s1281_s8  ;;  %vm325_vm0 = vcmask (!%p307_p6), 1039360   ;;  %vm340_vm1 = vcmask (!%p307_p6), 1031168   ;;  %vm355_vm2 = vcmask (!%p307_p6), 1022976   ;;  %vm370_vm3 = vcmask (!%p307_p6), 1014784  }
  0x8e   : > { %310 = sbr.rel (%p307_p6) target bundleno = 297 (0x129), region = 64  ;;  %s330_s1 = sld [smem:[#allocation8 + %s329_s0]] (!%p307_p6)  ;;  %vm385_vm4 = vcmask (!%p307_p6), 1006592   ;;  %vm400_vm5 = vcmask (!%p307_p6), 998400   ;;  %vm415_vm6 = vcmask (!%p307_p6), 990208   ;;  %v419_v52 = vld [vmem:[%s1283_s11] sm:$0xff] (!%p307_p6) }
  0x8f   : > { %s315_s16 = sld [smem:[#allocation8 + %s314_s13]] (!%p307_p6)  ;;  %s344_s24 = sadd.s32 (!%p307_p6), 3, %s1281_s8 }
  0x90   : > { %s345_s25 = sld [smem:[#allocation8 + %s344_s24]] (!%p307_p6)  ;;  %s359_s29 = sadd.s32 (!%p307_p6), 4, %s1281_s8 }
  0x91   : > { %s360_s27 = sld [smem:[#allocation8 + %s359_s29]] (!%p307_p6)  ;;  %s374_s9 = sadd.s32 (!%p307_p6), 5, %s1281_s8 }
  0x92   : > { %s1046_s14 = smov (!%p307_p6), 126   ;;  %s1047_s17 = smov (!%p307_p6), 127  }
  0x93   : > { %s375_s10 = sld [smem:[#allocation8 + %s374_s9]] (!%p307_p6)  ;;  %s389_s0 = sadd.s32 (!%p307_p6), 6, %s1281_s8 }
  0x94   : > { %v331_v3 = vstv (!%p307_p6), %s330_s1  ;;  %s390_s1 = sld [smem:[#allocation8 + %s389_s0]] (!%p307_p6)  ;;  %s404_s13 = sadd.s32 (!%p307_p6), 7, %s1281_s8 }
  0x95   : > { %v332_v4 = vmul.f32 %v331_v3, %v1271_v0  ;;  %v316_v5 = vstv %s315_s16  ;;  %v333_v7 = vmul.f32 %v331_v3, %v1273_v1  ;;  %s1048_s16 = smov 125   ;;  %s405_s24 = sld [smem:[#allocation8 + %s404_s13]] }
  0x96   : > { %v317_v6 = vmul.f32 %v316_v5, %v1271_v0  ;;  %v318_v8 = vmul.f32 %v316_v5, %v1273_v1  ;;  %v346_v9 = vstv %s345_s25  ;;  %s1049_s25 = smov 124   ;;  %s1050_s29 = smov 123  }
  0x97   : > { %336 = vrot.lane.b32.xlu1 %v332_v4, %s1046_s14  ;;  %v348_v10 = vmul.f32 %v346_v9, %v1273_v1  ;;  %v347_v11 = vmul.f32 %v346_v9, %v1271_v0  ;;  %v361_v12 = vstv %s360_s27  ;;  %s1051_s27 = smov 122   ;;  %s1052_s9 = smov 121  }
  0x98   : > { %321 = vrot.lane.b32.xlu0 %v317_v6, %s1047_s17  ;;  %v363_v13 = vmul.f32 %v361_v12, %v1273_v1  ;;  %v362_v14 = vmul.f32 %v361_v12, %v1271_v0 }
  0x99   : > { %v376_v15 = vstv %s375_s10 }
  0x9a   : > { %v378_v16 = vmul.f32 %v376_v15, %v1273_v1  ;;  %v377_v17 = vmul.f32 %v376_v15, %v1271_v0  ;;  %v391_v18 = vstv %s390_s1 }
  0x9b   : > { %338 = vrot.lane.b32.xlu1 %v333_v7, %s1046_s14  ;;  %v393_v19 = vmul.f32 %v391_v18, %v1273_v1  ;;  %v392_v20 = vmul.f32 %v391_v18, %v1271_v0  ;;  %v406_v21 = vstv %s405_s24  ;;  %s311_s14 = sld [smem:[#allocation8 + %s1281_s8]] }
  0x9c   : > { %323 = vrot.lane.b32.xlu0 %v318_v8, %s1047_s17  ;;  %v408_v22 = vmul.f32 %v406_v21, %v1273_v1  ;;  %v407_v23 = vmul.f32 %v406_v21, %v1271_v0 }
  0x9f   : > { %353 = vrot.lane.b32.xlu1 %v348_v10, %s1048_s16 }
  0xa0   : > { %351 = vrot.lane.b32.xlu0 %v347_v11, %s1048_s16 }
  0xa1   : > { %v312_v27 = vstv %s311_s14 }
  0xa2   : > { %v313_v29 = vmul.f32 %v312_v27, %v1271_v0 }
  0xa3   : > { %368 = vrot.lane.b32.xlu1 %v363_v13, %s1049_s25 }
  0xa4   : > { %366 = vrot.lane.b32.xlu0 %v362_v14, %s1049_s25 }
  0xa7   : > { %383 = vrot.lane.b32.xlu1 %v378_v16, %s1050_s29 }
  0xa8   : > { %381 = vrot.lane.b32.xlu0 %v377_v17, %s1050_s29 }
  0xab   : > { %398 = vrot.lane.b32.xlu1 %v393_v19, %s1051_s27 }
  0xac   : > { %396 = vrot.lane.b32.xlu0 %v392_v20, %s1051_s27 }
  0xaf   : > { %413 = vrot.lane.b32.xlu1 %v408_v22, %s1052_s9 }
  0xb0   : > { %411 = vrot.lane.b32.xlu0 %v407_v23, %s1052_s9 }
 0x109   : > { %v337_v24 = vpop.permute.xlu1 %336 }
 0x10a   : > { %v322_v25 = vpop.permute.xlu0 %321 }
 0x10d   : > { %v339_v26 = vpop.permute.xlu1 %338 }
 0x10e   : > { %v324_v28 = vpop.permute.xlu0 %323  ;;  %v341_v36 = vsel %vm340_vm1, %v337_v24, %v339_v26 }
 0x10f   : > { %v326_v30 = vsel %vm325_vm0, %v322_v25, %v324_v28 }
 0x110   : > { %v328_v33 = vadd.f32 %v326_v30, %v313_v29 }
 0x111   : > { %v354_v31 = vpop.permute.xlu1 %353 }
 0x112   : > { %v352_v32 = vpop.permute.xlu0 %351  ;;  %v343_v37 = vadd.f32 %v341_v36, %v328_v33 }
 0x113   : > { %v356_v38 = vsel %vm355_vm2, %v352_v32, %v354_v31 }
 0x114   : > { %v358_v42 = vadd.f32 %v356_v38, %v343_v37 }
 0x115   : > { %v369_v34 = vpop.permute.xlu1 %368 }
 0x116   : > { %v367_v35 = vpop.permute.xlu0 %366 }
 0x117   : > { %v371_v41 = vsel %vm370_vm3, %v367_v35, %v369_v34 }
 0x118   : > { %v373_v45 = vadd.f32 %v371_v41, %v358_v42 }
 0x119   : > { %v384_v39 = vpop.permute.xlu1 %383 }
 0x11a   : > { %v382_v40 = vpop.permute.xlu0 %381 }
 0x11b   : > { %v386_v43 = vsel %vm385_vm4, %v382_v40, %v384_v39 }
 0x11c   : > { %v388_v48 = vadd.f32 %v386_v43, %v373_v45 }
 0x11d   : > { %v399_v44 = vpop.permute.xlu1 %398 }
 0x11e   : > { %v397_v46 = vpop.permute.xlu0 %396 }
 0x11f   : > { %v401_v47 = vsel %vm400_vm5, %v397_v46, %v399_v44 }
 0x120   : > { %v403_v50 = vadd.f32 %v401_v47, %v388_v48 }
 0x121   : > { %v414_v49 = vpop.permute.xlu1 %413 }
 0x122   : > { %v412_v51 = vpop.permute.xlu0 %411 }
 0x123   : > { %v416_v53 = vsel %vm415_vm6, %v412_v51, %v414_v49 }
 0x124   : > { %v418_v54 = vadd.f32 %v416_v53, %v403_v50 }
 0x126   : > { %v420_v55 = vadd.f32 %v419_v52, %v418_v54 }
 0x128   : > { %421 = vst [vmem:[%s1283_s11] sm:$0xff] %v420_v55 }
 0x129 PF: > { %p422_p7 = scmp.le.s32.totalorder %s1269_s15, 1  ;;  %p423_p9 = scmp.gt.s32.totalorder %s1278_s12, 1 }
 0x12b   : > { %p424_p0 = pnand %p423_p9, %p422_p7 }
 0x12c   : > { %s450_s17 = sadd.s32 (!%p424_p0), 10, %s1281_s8  ;;  %s433_s0 = sadd.s32 (!%p424_p0), 9, %s1281_s8  ;;  %vm444_vm7 = vcmask (!%p424_p0), 1039360   ;;  %vm461_vm8 = vcmask (!%p424_p0), 1031168   ;;  %vm478_vm9 = vcmask (!%p424_p0), 1022976   ;;  %vm495_vm10 = vcmask (!%p424_p0), 1014784  }
 0x12d   : > { %427 = sbr.rel (%p424_p0) target bundleno = 572 (0x23c), region = 68  ;;  %s451_s10 = sld [smem:[#allocation8 + %s450_s17]] (!%p424_p0)  ;;  %vm512_vm11 = vcmask (!%p424_p0), 1006592   ;;  %vm529_vm12 = vcmask (!%p424_p0), 998400   ;;  %vm546_vm13 = vcmask (!%p424_p0), 990208   ;;  %vm559_vm14 = vcmask (!%p424_p0), 982016  }
 0x12e   : > { %s434_s1 = sld [smem:[#allocation8 + %s433_s0]] (!%p424_p0)  ;;  %s467_s13 = sadd.s32 (!%p424_p0), 11, %s1281_s8 }
 0x12f   : > { %s468_s16 = sld [smem:[#allocation8 + %s467_s13]] (!%p424_p0)  ;;  %s484_s24 = sadd.s32 (!%p424_p0), 12, %s1281_s8  ;;  %v552_v52 = vld [vmem:[%s1283_s11] sm:$0xff] (!%p424_p0) }
 0x130   : > { %s485_s25 = sld [smem:[#allocation8 + %s484_s24]] (!%p424_p0)  ;;  %s501_s15 = sadd.s32 (!%p424_p0), 13, %s1281_s8 }
 0x131   : > { %s1053_s12 = smov (!%p424_p0), 126   ;;  %s1054_s29 = smov (!%p424_p0), 127  }
 0x132   : > { %s502_s27 = sld [smem:[#allocation8 + %s501_s15]] (!%p424_p0)  ;;  %s518_s9 = sadd.s32 (!%p424_p0), 14, %s1281_s8 }
 0x133   : > { %v452_v56 = vstv (!%p424_p0), %s451_s10  ;;  %s519_s14 = sld [smem:[#allocation8 + %s518_s9]] (!%p424_p0)  ;;  %s535_s17 = sadd.s32 (!%p424_p0), 15, %s1281_s8 }
 0x134   : > { %v453_v57 = vmul.f32 %v452_v56, %v1271_v0  ;;  %v435_v58 = vstv %s434_s1  ;;  %v454_v60 = vmul.f32 %v452_v56, %v1273_v1  ;;  %s1055_s10 = smov 125   ;;  %s536_s0 = sld [smem:[#allocation8 + %s535_s17]] }
 0x135   : > { %v436_v59 = vmul.f32 %v435_v58, %v1271_v0  ;;  %v437_v61 = vmul.f32 %v435_v58, %v1273_v1  ;;  %v469_v62 = vstv %s468_s16  ;;  %s1056_s1 = smov 124   ;;  %s1057_s13 = smov 123  }
 0x136   : > { %457 = vrot.lane.b32.xlu1 %v453_v57, %s1053_s12  ;;  %v471_v63 = vmul.f32 %v469_v62, %v1273_v1  ;;  %v470_v2 = vmul.f32 %v469_v62, %v1271_v0  ;;  %v486_v3 = vstv %s485_s25  ;;  %s1058_s16 = smov 122   ;;  %s1059_s24 = smov 121  }
 0x137   : > { %440 = vrot.lane.b32.xlu0 %v436_v59, %s1054_s29  ;;  %v488_v4 = vmul.f32 %v486_v3, %v1273_v1  ;;  %v487_v5 = vmul.f32 %v486_v3, %v1271_v0  ;;  %s428_s25 = sadd.s32 8, %s1281_s8  ;;  %s1060_s8 = smov 120  }
 0x138   : > { %v503_v6 = vstv %s502_s27  ;;  %s429_s15 = sld [smem:[#allocation8 + %s428_s25]] }
 0x139   : > { %v505_v7 = vmul.f32 %v503_v6, %v1273_v1  ;;  %v504_v8 = vmul.f32 %v503_v6, %v1271_v0  ;;  %v520_v9 = vstv %s519_s14 }
 0x13a   : > { %459 = vrot.lane.b32.xlu1 %v454_v60, %s1053_s12  ;;  %v522_v10 = vmul.f32 %v520_v9, %v1273_v1  ;;  %v521_v11 = vmul.f32 %v520_v9, %v1271_v0  ;;  %v537_v12 = vstv %s536_s0 }
 0x13b   : > { %442 = vrot.lane.b32.xlu0 %v437_v61, %s1054_s29  ;;  %v539_v13 = vmul.f32 %v537_v12, %v1273_v1  ;;  %v538_v14 = vmul.f32 %v537_v12, %v1271_v0 }
 0x13e   : > { %476 = vrot.lane.b32.xlu1 %v471_v63, %s1055_s10  ;;  %v430_v17 = vstv %s429_s15 }
 0x13f   : > { %474 = vrot.lane.b32.xlu0 %v470_v2, %s1055_s10  ;;  %v432_v20 = vmul.f32 %v430_v17, %v1273_v1  ;;  %v431_v21 = vmul.f32 %v430_v17, %v1271_v0 }
 0x142   : > { %493 = vrot.lane.b32.xlu1 %v488_v4, %s1056_s1 }
 0x143   : > { %491 = vrot.lane.b32.xlu0 %v487_v5, %s1056_s1 }
 0x146   : > { %510 = vrot.lane.b32.xlu1 %v505_v7, %s1057_s13 }
 0x147   : > { %508 = vrot.lane.b32.xlu0 %v504_v8, %s1057_s13 }
 0x14a   : > { %527 = vrot.lane.b32.xlu1 %v522_v10, %s1058_s16 }
 0x14b   : > { %525 = vrot.lane.b32.xlu0 %v521_v11, %s1058_s16 }
 0x14e   : > { %544 = vrot.lane.b32.xlu1 %v539_v13, %s1059_s24 }
 0x14f   : > { %542 = vrot.lane.b32.xlu0 %v538_v14, %s1059_s24 }
 0x1a8   : > { %v458_v15 = vpop.permute.xlu1 %457 }
 0x1a9   : > { %v441_v16 = vpop.permute.xlu0 %440 }
 0x1ac   : > { %v460_v18 = vpop.permute.xlu1 %459 }
 0x1ad   : > { %v443_v19 = vpop.permute.xlu0 %442  ;;  %v462_v30 = vsel %vm461_vm8, %v458_v15, %v460_v18 }
 0x1ae   : > { %v445_v22 = vsel %vm444_vm7, %v441_v16, %v443_v19  ;;  %v449_v24 = vadd.f32 %v443_v19, %v432_v20 }
 0x1af   : > { %v448_v26 = vadd.f32 %v445_v22, %v431_v21 }
 0x1b0   : > { %v477_v23 = vpop.permute.xlu1 %476  ;;  %v466_v28 = vadd.f32 %v460_v18, %v449_v24 }
 0x1b1   : > { %v475_v25 = vpop.permute.xlu0 %474  ;;  %v465_v31 = vadd.f32 %v462_v30, %v448_v26 }
 0x1b2   : > { %v479_v32 = vsel %vm478_vm9, %v475_v25, %v477_v23  ;;  %v483_v34 = vadd.f32 %v477_v23, %v466_v28 }
 0x1b3   : > { %v482_v0 = vadd.f32 %v479_v32, %v465_v31 }
 0x1b4   : > { %v494_v27 = vpop.permute.xlu1 %493 }
 0x1b5   : > { %v492_v29 = vpop.permute.xlu0 %491  ;;  %v500_v36 = vadd.f32 %v494_v27, %v483_v34 }
 0x1b6   : > { %v496_v35 = vsel %vm495_vm10, %v492_v29, %v494_v27 }
 0x1b7   : > { %v499_v39 = vadd.f32 %v496_v35, %v482_v0 }
 0x1b8   : > { %v511_v33 = vpop.permute.xlu1 %510 }
 0x1b9   : > { %v509_v1 = vpop.permute.xlu0 %508  ;;  %v517_v40 = vadd.f32 %v511_v33, %v500_v36 }
 0x1ba   : > { %v513_v37 = vsel %vm512_vm11, %v509_v1, %v511_v33 }
 0x1bb   : > { %v516_v43 = vadd.f32 %v513_v37, %v499_v39 }
 0x1bc   : > { %v528_v38 = vpop.permute.xlu1 %527 }
 0x1bd   : > { %v526_v41 = vpop.permute.xlu0 %525  ;;  %v534_v44 = vadd.f32 %v528_v38, %v517_v40 }
 0x1be   : > { %v530_v42 = vsel %vm529_vm12, %v526_v41, %v528_v38 }
 0x1bf   : > { %v533_v46 = vadd.f32 %v530_v42, %v516_v43 }
 0x1c0   : > { %v545_v45 = vpop.permute.xlu1 %544 }
 0x1c1   : > { %v551_v47 = vadd.f32 %v545_v45, %v534_v44  ;;  %v543_v48 = vpop.permute.xlu0 %542 }
 0x1c2   : > { %v547_v49 = vsel %vm546_vm13, %v543_v48, %v545_v45 }
 0x1c3   : > { %v550_v50 = vadd.f32 %v547_v49, %v533_v46  ;;  %557 = vrot.lane.b32.xlu1 %v551_v47, %s1060_s8 }
 0x1c5   : > { %555 = vrot.lane.b32.xlu0 %v550_v50, %s1060_s8 }
 0x235   : > { %v558_v51 = vpop.permute.xlu1 %557 }
 0x237   : > { %v556_v53 = vpop.permute.xlu0 %555 }
 0x238   : > { %v560_v54 = vsel %vm559_vm14, %v556_v53, %v558_v51 }
 0x239   : > { %v562_v55 = vadd.f32 %v560_v54, %v552_v52 }
 0x23b   : > { %563 = vst [vmem:[%s1283_s11] sm:$0xff] %v562_v55 }
 0x23c PF: > { %s713_s12 = sshll.u32 %s1030_s21, 7  ;;  %s579_s14 = sshll.u32 %s1283_s11, 4  ;;  %s580_s14 = int_to_ptr.vmem [resolvable:$true] %s579_s14 }
 0x23d   : > { %s1345_s9 = scalar_lea.hbm %s1394_s5, %s713_s12  ;;  %s565_s17 = scalar_lea.sflag [#allocation4], %s295_s7 }
 0x23e   : > { %s940_s10 = scalar_lea.vmem %s580_s14, 128  ;;  %p1413_p8 = scmp.ne.s32.totalorder %s1402_s28, 0 }
 0x23f   : > { %p941_p4 = scmp.ne.s32.totalorder %s580_s14, %s940_s10  ;;  %s1061_s0 = smov [#allocation13]  }
 0x240   : > { %s944_s1 = sshll.u32 %s1061_s0, 4  ;;  %s945_s1 = int_to_ptr.vmem [resolvable:$false] %s944_s1 }
 0x241   : > { %p942_p11 = pnand %p941_p4, %p1413_p8  ;;  %s946_s13 = scalar_lea.vmem %s945_s1, 256 }
 0x242   : > { %p947_p2 = scmp.lt.s32.totalorder %s580_s14, %s945_s1  ;;  %p948_p3 = scmp.lt.s32.totalorder %s946_s13, %s940_s10 }
 0x243   : > { %p943_p10 = pneg %p942_p11 }
 0x244   : > { %p949_p5 = por %p948_p3, %p947_p2 }
 0x246   : > { %p950_p12 = pnand %p949_p5, %p943_p10 }
 0x248   : > { %953 = shalt.err (!%p950_p12)
}
 0x249   : > { %s954_s21 = scalar_lea.hbm %s1345_s9, 128  ;;  %s958_s16 = scalar_lea.hbm %s1394_s5, 768 }
 0x24a   : > { %p955_p13 = scmp.ne.s32.totalorder %s1345_s9, %s954_s21  ;;  %p959_p7 = scmp.lt.u32.totalorder %s1345_s9, %s1394_s5 }
 0x24b   : > { %p960_p9 = scmp.lt.u32.totalorder %s958_s16, %s954_s21  ;;  %p962_p4 = scmp.lt.u32.totalorder %s954_s21, %s1345_s9 }
 0x24c   : > { %p956_p1 = pnand %p955_p13, %p1413_p8 }
 0x24d   : > { %p961_p0 = por %p960_p9, %p959_p7 }
 0x24e   : > { %p957_p6 = pneg %p956_p1 }
 0x24f   : > { %p963_p11 = por %p962_p4, %p961_p0 }
 0x251   : > { %p964_p10 = pnand %p963_p11, %p957_p6 }
 0x253   : > { %967 = shalt.err (!%p964_p10)
}
 0x254   : > { %736 = dma.vmem_to_hbm [thread:$0]  (%p1413_p8), %s580_s14, 128, %s1345_s9, %s565_s17  }
 0x255 PF: > { %p768_p2 = scmp.ge.s32.totalorder %s1038_s23, 2  ;;  %s591_s15 = sand.u32 1, %s1018_s18  }
 0x256   : > { %p1414_p3 = scmp.ne.s32.totalorder %s1403_s30, 0  ;;  %s592_s8 = scalar_lea.sflag [#allocation4], %s591_s15 }
 0x258   : > { %p755_p5 = pnand %p768_p2, %p1414_p3 }
 0x25a   : > { %1013 = dma.done.wait (!%p755_p5), %s592_s8, 128  }
 0x25b   : > { %1015 = vsyncadd (!%p755_p5), %s592_s8, 4294967168  ;;  %s23_s23 = sadd.s32 1, %s1038_s23   ;;  %s1415_s18 = smov %s1022_s19 }
 0x25c   : > { %p20_p12 = scmp.ge.s32.totalorder %s23_s23, 8   ;;  %s1416_s19 = smov %s1026_s20 }
 0x25d   : > { %s1417_s20 = smov %s1145_s6  ;;  %s1418_s21 = smov %s1034_s22 }
 0x25e   : > { %s1419_s22 = smov %s1421_s26  ;;  %22 = sbr.rel (!%p20_p12) target bundleno = 12 (0xc), region = 105 }
 0x265   :  { %597 = vsyncpa [#allocation3], 1 }
 0x266   :  { %599 = vsyncpa [#allocation3 + $0x1], 1 }
 0x267   :  { %600 = vsyncpa [#allocation12], 1 }
 0x268   :  { %601 = vsyncpa [#allocation4], 1 }
 0x269   :  { %603 = vsyncpa [#allocation4 + $0x1], 1 }
 0x26a   :  { %604 = vsyncpa [#allocation5], 1 }
 0x26b   :  { %606 = vsyncpa [#allocation5 + $0x1], 1 }
 0x26c   :  { %607 = vsyncpa [#allocation6], 1 }
 0x26d   :  { %609 = vsyncpa [#allocation6 + $0x1], 1 }
 0x26e   :  { %610 = vsyncpa [#allocation9], 1 }

</bundles_post_ra>
